<compile_context>
chip_gen: v7x
topology: tpu7x:2x2x1
jax: 0.10.0
libtpu: 0.0.40
codegen_flags: <defaults>
</compile_context>

<pallas_src>
import jax
import jax.numpy as jnp
from jax.experimental import pallas as pl
from jax.experimental.pallas import tpu as pltpu

C = 2048                 # channel count hard-coded by the module's reshape
H = W = 14
S = H * W                # 196 spatial positions
N = C * S                # 401408 elements of feature_map per batch element
LANES = 128
SUBLANES = 8
GROUPS = N // (SUBLANES * LANES)   # 392 (8,128)-tiles per batch element
K_STEPS = 2                        # reduction grid steps per batch element
TG = GROUPS // K_STEPS             # 196 tiles (= 784 KB f32) per grid step
assert GROUPS % K_STEPS == 0


def _cls_kernel(fm_ref, wf_ref, wt_ref, b_ref, out_ref, acc_ref):
    # fm_ref : (1, TG, 8, 128)  lane-dense slice of the flattened feature map
    # wf_ref : (1, P, S)        one batch element of weighted_feature (constant over k)
    # wt_ref : (P+1, 2)         fc_cls.weight.T (constant over grid)
    # b_ref  : (1, 2)           fc_cls.bias
    # out_ref: (1, 1, 2)        written only on the last k-step
    # acc_ref: (8, 128) f32     running partial sum (pure VPU adds)
    k = pl.program_id(1)

    @pl.when(k == 0)
    def _():
        acc_ref[...] = jnp.zeros_like(acc_ref)

    # Reduce over the leading (vreg-group) axis: elementwise VPU adds only,
    # no per-row XLU lane reductions.  f32 accumulation regardless of input dtype.
    blk = fm_ref[0].astype(jnp.float32)                 # (TG, 8, 128)
    acc_ref[...] += jnp.sum(blk, axis=0)                # (8, 128)

    @pl.when(k == pl.num_programs(1) - 1)
    def _():
        # Single cross-lane/sublane reduce per batch element -> global mean == channel 0
        comp = jnp.sum(acc_ref[...], keepdims=True) * (1.0 / N)          # (1, 1)

        # Per-part spatial means (tiny: P rows of 196 lanes, once per batch element).
        wf = wf_ref[0].astype(jnp.float32)                               # (P, S)
        part_means = jnp.sum(wf, axis=-1, keepdims=True) * (1.0 / S)     # (P, 1)

        # fc_cls over [comp, part_means...] expressed as a split dot product.
        w = wt_ref[...]                                                  # (P+1, 2)
        out = w[0:1, :] * comp                                           # (1, 2)
        out = out + jnp.sum(w[1:, :] * part_means, axis=0, keepdims=True)
        out_ref[0] = (out + b_ref[...]).astype(out_ref.dtype)


def cls_forward(feature_map, weighted_feature, weight, bias, part_num):
    """feature_map: (B, 2048, 14, 14), weighted_feature: (B, part_num, 14, 14),
    weight: (2, part_num+1), bias: (2,)  ->  (B, 2)"""
    B = feature_map.shape[0]
    P1 = part_num + 1

    # Layout-only, contiguous reshapes (no transpose -> no extra HBM traffic).
    fm = feature_map.reshape(B, GROUPS, SUBLANES, LANES)       # (B, 392, 8, 128)
    wf = weighted_feature.reshape(B, part_num, S)              # (B, P, 196)
    wt = weight.T.astype(jnp.float32)                          # (P+1, 2)
    b2 = bias.reshape(1, 2).astype(jnp.float32)

    out = pl.pallas_call(
        _cls_kernel,
        out_shape=jax.ShapeDtypeStruct((B, 1, 2), jnp.float32),
        grid_spec=pltpu.PrefetchScalarGridSpec(
            num_scalar_prefetch=0,
            grid=(B, K_STEPS),
            in_specs=[
                pl.BlockSpec((1, TG, SUBLANES, LANES), lambda b, k: (b, k, 0, 0)),
                pl.BlockSpec((1, part_num, S), lambda b, k: (b, 0, 0)),  # const in k
                pl.BlockSpec((P1, 2), lambda b, k: (0, 0)),              # const in b,k
                pl.BlockSpec((1, 2), lambda b, k: (0, 0)),               # const in b,k
            ],
            out_specs=pl.BlockSpec((1, 1, 2), lambda b, k: (b, 0, 0)),
            scratch_shapes=[pltpu.VMEM((SUBLANES, LANES), jnp.float32)],
        ),
        compiler_params=pltpu.CompilerParams(
            dimension_semantics=("parallel", "arbitrary")),  # batch parallel -> 2 TCs on v7x
    )(fm, wf, wt, b2)
    return out.reshape(B, 2)


if __name__ == "__main__":
    key = jax.random.PRNGKey(0)
    B, part_num = 2, 4                     # module hard-codes 2048 channels / 14x14 spatial
    k1, k2, k3, k4 = jax.random.split(key, 4)

    feature_map = jax.random.normal(k1, (B, C, H, W), jnp.float32)
    weighted_feature = jax.random.normal(k2, (B, part_num, H, W), jnp.float32)

    # deterministic fc_cls parameters (PyTorch-style uniform init bounds)
    fan_in = part_num + 1
    bound = 1.0 / (fan_in ** 0.5)
    weight = jax.random.uniform(k3, (2, fan_in), jnp.float32, -bound, bound)
    bias = jax.random.uniform(k4, (2,), jnp.float32, -bound, bound)

    out = cls_forward(feature_map, weighted_feature, weight, bias, part_num)
    out = jax.block_until_ready(out)

    # plain-JAX reference of the same forward pass
    comp_ref = feature_map.reshape(B, C, S).mean(axis=1).mean(axis=1)            # (B,)
    parts_ref = weighted_feature.reshape(B, part_num, S).mean(axis=-1)           # (B, P)
    v_ref = jnp.concatenate([comp_ref[:, None], parts_ref], axis=1)              # (B, P+1)
    ref = v_ref @ weight.T + bias                                                # (B, 2)

    assert out.shape == (B, 2)
    assert jnp.allclose(out, ref, atol=1e-4, rtol=1e-4), (out, ref)
    print("KERNEL_OK")
</pallas_src>

<mosaic_0001>
module attributes {stable_mosaic.version = 11 : i64} {
  func.func @_cls_kernel(%arg0: i32, %arg1: i32, %arg2: memref<1x196x8x128xf32, #tpu.memory_space<vmem>>, %arg3: memref<1x4x196xf32, #tpu.memory_space<vmem>>, %arg4: memref<5x2xf32, #tpu.memory_space<vmem>>, %arg5: memref<1x2xf32, #tpu.memory_space<vmem>>, %arg6: memref<1x1x2xf32, #tpu.memory_space<vmem>>, %arg7: memref<8x128xf32, #tpu.memory_space<vmem>>) attributes {dimension_semantics = [#tpu.dimension_semantics<parallel>, #tpu.dimension_semantics<arbitrary>], iteration_bounds = array<i64: 2, 2>, scalar_prefetch = 0 : i64, scratch_operands = 1 : i64, tpu.core_type = #tpu.core_type<tc>, window_params = [{transform_indices = @transform_0, window_bounds = array<i64: 1, 196, 8, 128>}, {transform_indices = @transform_1, window_bounds = array<i64: 1, 4, 196>}, {pipeline_mode = #tpu.pipeline_mode<synchronous>, transform_indices = @transform_2, window_bounds = array<i64: 5, 2>}, {pipeline_mode = #tpu.pipeline_mode<synchronous>, transform_indices = @transform_3, window_bounds = array<i64: 1, 2>}, {transform_indices = @transform_4, window_bounds = array<i64: 1, 1, 2>}]} {
    %c0_i32 = arith.constant 0 : i32
    %0 = arith.cmpi eq, %arg1, %c0_i32 : i32
    %1 = arith.extui %0 : i1 to i32
    %c0_i32_0 = arith.constant 0 : i32
    %2 = arith.cmpi ne, %1, %c0_i32_0 : i32
    scf.if %2 {
      %cst_9 = arith.constant 0.000000e+00 : f32
      %12 = vector.broadcast %cst_9 : f32 to vector<8x128xf32>
      %c0_10 = arith.constant 0 : index
      %c0_11 = arith.constant 0 : index
      %13 = vector.load %arg7[%c0_10, %c0_11] : memref<8x128xf32, #tpu.memory_space<vmem>>, vector<8x128xf32>
      tpu.vector_store %arg7[%c0_10, %c0_11], %12 {strides = array<i32>} : memref<8x128xf32, #tpu.memory_space<vmem>>, vector<8x128xf32>,
    } else {
    }
    %c0 = arith.constant 0 : index
    %c0_1 = arith.constant 0 : index
    %c0_2 = arith.constant 0 : index
    %c0_3 = arith.constant 0 : index
    %3 = vector.load %arg2[%c0, %c0_1, %c0_2, %c0_3] : memref<1x196x8x128xf32, #tpu.memory_space<vmem>>, vector<1x196x8x128xf32>
    %4 = vector.shape_cast %3 : vector<1x196x8x128xf32> to vector<196x8x128xf32>
    %c0_4 = arith.constant 0 : index
    %c0_5 = arith.constant 0 : index
    %5 = vector.load %arg7[%c0_4, %c0_5] : memref<8x128xf32, #tpu.memory_space<vmem>>, vector<8x128xf32>
    %cst = arith.constant dense<0.000000e+00> : vector<8x128xf32>
    %6 = vector.multi_reduction <add>, %4, %cst [0] : vector<196x8x128xf32> to vector<8x128xf32>
    %7 = arith.addf %5, %6 : vector<8x128xf32>
    %c0_6 = arith.constant 0 : index
    %c0_7 = arith.constant 0 : index
    %8 = vector.load %arg7[%c0_6, %c0_7] : memref<8x128xf32, #tpu.memory_space<vmem>>, vector<8x128xf32>
    tpu.vector_store %arg7[%c0_6, %c0_7], %7 {strides = array<i32>} : memref<8x128xf32, #tpu.memory_space<vmem>>, vector<8x128xf32>,
    %c1_i32 = arith.constant 1 : i32
    %9 = arith.cmpi eq, %arg1, %c1_i32 : i32
    %10 = arith.extui %9 : i1 to i32
    %c0_i32_8 = arith.constant 0 : i32
    %11 = arith.cmpi ne, %10, %c0_i32_8 : i32
    scf.if %11 {
      %c0_9 = arith.constant 0 : index
      %c0_10 = arith.constant 0 : index
      %12 = vector.load %arg7[%c0_9, %c0_10] : memref<8x128xf32, #tpu.memory_space<vmem>>, vector<8x128xf32>
      %13 = vector.shape_cast %12 : vector<8x128xf32> to vector<1x8x128xf32>
      %cst_11 = arith.constant dense<0.000000e+00> : vector<1xf32>
      %14 = vector.multi_reduction <add>, %13, %cst_11 [1, 2] : vector<1x8x128xf32> to vector<1xf32>
      %15 = vector.shape_cast %14 : vector<1xf32> to vector<1x1x1xf32>
      %16 = vector.extract %15[0, 0, 0] : f32 from vector<1x1x1xf32>
      %17 = vector.broadcast %16 : f32 to vector<1x1xf32>
      %cst_12 = arith.constant 2.49123082E-6 : f32
      %18 = vector.broadcast %cst_12 : f32 to vector<1x1xf32>
      %19 = arith.mulf %17, %18 : vector<1x1xf32>
      %c0_13 = arith.constant 0 : index
      %c0_14 = arith.constant 0 : index
      %c0_15 = arith.constant 0 : index
      %20 = vector.load %arg3[%c0_13, %c0_14, %c0_15] : memref<1x4x196xf32, #tpu.memory_space<vmem>>, vector<1x4x196xf32>
      %21 = vector.shape_cast %20 : vector<1x4x196xf32> to vector<4x196xf32>
      %cst_16 = arith.constant dense<0.000000e+00> : vector<4xf32>
      %22 = vector.multi_reduction <add>, %21, %cst_16 [1] : vector<4x196xf32> to vector<4xf32>
      %23 = vector.shape_cast %22 : vector<4xf32> to vector<4x1xf32>
      %cst_17 = arith.constant 0.00510204071 : f32
      %24 = vector.broadcast %cst_17 : f32 to vector<4x1xf32>
      %25 = arith.mulf %23, %24 : vector<4x1xf32>
      %c0_18 = arith.constant 0 : index
      %c0_19 = arith.constant 0 : index
      %26 = vector.load %arg4[%c0_18, %c0_19] : memref<5x2xf32, #tpu.memory_space<vmem>>, vector<5x2xf32>
      %27 = vector.extract_strided_slice %26 {offsets = [0, 0], sizes = [1, 2], strides = [1, 1]} : vector<5x2xf32> to vector<1x2xf32>
      %28 = vector.broadcast %19 : vector<1x1xf32> to vector<1x2xf32>
      %29 = arith.mulf %27, %28 : vector<1x2xf32>
      %30 = vector.extract_strided_slice %26 {offsets = [1, 0], sizes = [4, 2], strides = [1, 1]} : vector<5x2xf32> to vector<4x2xf32>
      %31 = vector.broadcast %25 : vector<4x1xf32> to vector<4x2xf32>
      %32 = arith.mulf %30, %31 : vector<4x2xf32>
      %cst_20 = arith.constant dense<0.000000e+00> : vector<2xf32>
      %33 = vector.multi_reduction <add>, %32, %cst_20 [0] : vector<4x2xf32> to vector<2xf32>
      %34 = vector.shape_cast %33 : vector<2xf32> to vector<1x2xf32>
      %35 = arith.addf %29, %34 : vector<1x2xf32>
      %c0_21 = arith.constant 0 : index
      %c0_22 = arith.constant 0 : index
      %36 = vector.load %arg5[%c0_21, %c0_22] : memref<1x2xf32, #tpu.memory_space<vmem>>, vector<1x2xf32>
      %37 = arith.addf %35, %36 : vector<1x2xf32>
      %c0_23 = arith.constant 0 : index
      %c0_24 = arith.constant 0 : index
      %c0_25 = arith.constant 0 : index
      %38 = vector.load %arg6[%c0_23, %c0_24, %c0_25] : memref<1x1x2xf32, #tpu.memory_space<vmem>>, vector<1x1x2xf32>
      %39 = vector.shape_cast %38 : vector<1x1x2xf32> to vector<1x2xf32>
      %40 = vector.shape_cast %37 : vector<1x2xf32> to vector<1x1x2xf32>
      tpu.vector_store %arg6[%c0_23, %c0_24, %c0_25], %40 {strides = array<i32>} : memref<1x1x2xf32, #tpu.memory_space<vmem>>, vector<1x1x2xf32>,
    } else {
    }
    return
  }
  func.func @transform_0(%arg0: i32, %arg1: i32) -> (i32, i32, i32, i32) {
    %c0_i32 = arith.constant 0 : i32
    %c0_i32_0 = arith.constant 0 : i32
    %c0_i32_1 = arith.constant 0 : i32
    return %arg0, %arg1, %c0_i32, %c0_i32_0 : i32, i32, i32, i32
  }
  func.func @transform_1(%arg0: i32, %arg1: i32) -> (i32, i32, i32) {
    %c0_i32 = arith.constant 0 : i32
    %c0_i32_0 = arith.constant 0 : i32
    %c0_i32_1 = arith.constant 0 : i32
    return %arg0, %c0_i32, %c0_i32_0 : i32, i32, i32
  }
  func.func @transform_2(%arg0: i32, %arg1: i32) -> (i32, i32) {
    %c0_i32 = arith.constant 0 : i32
    %c0_i32_0 = arith.constant 0 : i32
    %c0_i32_1 = arith.constant 0 : i32
    return %c0_i32, %c0_i32_0 : i32, i32
  }
  func.func @transform_3(%arg0: i32, %arg1: i32) -> (i32, i32) {
    %c0_i32 = arith.constant 0 : i32
    %c0_i32_0 = arith.constant 0 : i32
    %c0_i32_1 = arith.constant 0 : i32
    return %c0_i32, %c0_i32_0 : i32, i32
  }
  func.func @transform_4(%arg0: i32, %arg1: i32) -> (i32, i32, i32) {
    %c0_i32 = arith.constant 0 : i32
    %c0_i32_0 = arith.constant 0 : i32
    %c0_i32_1 = arith.constant 0 : i32
    return %arg0, %c0_i32, %c0_i32_0 : i32, i32, i32
  }
}

</mosaic_0001>

<bundles_post_ra>
// kernel: tpu_custom_call.1
= control target key start
LH: loop header
LB: loop body
LE: loop exit
PB: predicated region body
PF: predicated region fallthrough
CT: control target
= control target key end

     0   :  { %s1785_s0 = inlined_call_operand.hbm [shape: f32[2,392,8,128], index: 0, kind: input, shape index: {}]   ;;  %s1786_s1 = inlined_call_operand.hbm [shape: f32[2,4,196], index: 1, kind: input, shape index: {}]   ;;  %s1787_s2 = inlined_call_operand.vmem [shape: f32[5,2], index: 2, kind: input, shape index: {}]   ;;  %s1788_s3 = inlined_call_operand.hbm [shape: f32[1,2], index: 3, kind: input, shape index: {}]   ;;  %s1789_s4 = inlined_call_operand.hbm [shape: f32[2,1,2], index: 4, kind: output, shape index: {}]  }
   0x1   :  { %1802 = sst [smem:[#allocation20_spill]] %s1788_s3 }
   0x2   :  { %1803 = sst [smem:[#allocation21_spill]] %s1789_s4 }
   0x3   :  { %9 = vsyncpa [#allocation4], 0 }
   0x4   :  { %11 = vsyncpa [#allocation4 + $0x1], 0 }
   0x5   :  { %12 = vsyncpa [#allocation7], 0 }
   0x6   :  { %14 = vsyncpa [#allocation7 + $0x1], 0 }
   0x7   :  { %15 = vsyncpa [#allocation5], 0 }
   0x8   :  { %17 = vsyncpa [#allocation5 + $0x1], 0  ;;  %s1253_s15 = smov 0   ;;  %s1255_s16 = smov 0  }
   0x9   :  { %s1257_s17 = smov 0   ;;  %s1259_s18 = smov 0  }
   0xa   :  { %s1261_s19 = smov 0   ;;  %s1263_s20 = smov 0  }
   0xb   :  { %s1265_s21 = smov 0   ;;  %s1267_s22 = smov 0  }
   0xc   :  { %s1269_s23 = smov 0   ;;  %s1271_s24 = smov 0  }
   0xd   :  { %s1273_s25 = smov 0  }
   0xe LB: > { %1804 = sst [smem:[#allocation14_spill]] %s1179_s15  ;;  %s1307_s26 = sadd.s32 4294967295, %s1219_s25   ;;  %s1219_s25 = sphi %s1273_s25, %s23_s25   ;;  %s1215_s24 = sphi %s1271_s24, %s1844_s24   ;;  %s1211_s23 = sphi %s1269_s23, %s1843_s23   ;;  %s1207_s22 = sphi %s1267_s22, %s1842_s22   ;;  %s1203_s21 = sphi %s1265_s21, %s1833_s21   ;;  %s1199_s20 = sphi %s1263_s20, %s1841_s20   ;;  %s1195_s19 = sphi %s1261_s19, %s1840_s19   ;;  %s1191_s18 = sphi %s1259_s18, %s1839_s18   ;;  %s1187_s17 = sphi %s1257_s17, %s1838_s17   ;;  %s1183_s16 = sphi %s1255_s16, %s1837_s16   ;;  %s1179_s15 = sphi %s1253_s15, %s1836_s15  }
   0xf   : > { %1805 = sst [smem:[#allocation15_spill]] %s1207_s22  ;;  %s857_s27 = sadd.s32 4294967294, %s1219_s25  }
  0x10   : > { %1806 = sst [smem:[#allocation16_spill]] %s1211_s23  ;;  %p57_p0 = scmp.ne.s32.totalorder %s1195_s19, %s1191_s18 }
  0x11   : > { %p1790_p1 = scmp.eq.s32.totalorder %s1307_s26, 0  ;;  %p83_p2 = scmp.ne.s32.totalorder %s1183_s16, %s1179_s15 }
  0x12   : > { %p155_p5 = scmp.eq.s32.totalorder %s857_s27, 3  ;;  %p858_p7 = scmp.ge.s32.totalorder %s1219_s25, 1 }
  0x13   : > { %p1317_p4 = por %p1790_p1, %p57_p0  ;;  %p1323_p6 = por %p83_p2, %p1790_p1 }
  0x14   : > { %p1328_p8 = por %p155_p5, %p83_p2  ;;  %p162_p9 = scmp.lt.s32.totalorder %s1219_s25, 5 }
  0x15   : > { %s1807_s28 = scalar_select %p1317_p4, 1, 0 }
  0x16   : > { %s1808_s29 = scalar_select %p1323_p6, 1, 0 }
  0x17   : > { %s1809_s30 = scalar_select %p1328_p8, 1, 0 }
  0x18   : > { %p1333_p10 = pnand %p858_p7, %p162_p9  ;;  %s1221_s6 = smov [#allocation8]  }
  0x19   : > { %1810 = sst [smem:[#allocation17_spill]] %s1809_s30  ;;  %s178_s7 = sshll.u32 %s1221_s6, 4  ;;  %s179_s7 = int_to_ptr.vmem [resolvable:$true] %s178_s7 }
  0x1a   : > { %s1811_s5 = scalar_select %p1333_p10, 1, 0 }
  0x1b   : > { %p889_p11 = pneg %p1333_p10  ;;  %s32_s9 = sadd.s32 1, %s1211_s23 }
  0x1c   : > { %s1813_s3 = sld [smem:[#allocation20_spill]] }
  0x1d   : > { %p1341_p12 = pnand %p889_p11, %p1790_p1 }
  0x1f   : > { %p1003_p0 = pneg %p1341_p12 }
  0x22   : > { %s1001_s12 = scalar_lea.hbm %s1813_s3, 16 }
  0x23   : > { %p1002_p13 = scmp.ne.s32.totalorder %s1813_s3, %s1001_s12  ;;  %p1008_p7 = scmp.lt.u32.totalorder %s1001_s12, %s1813_s3 }
  0x25   : > { %p1004_p2 = pnand %p1003_p0, %p1002_p13 }
  0x27   : > { %p1005_p5 = pneg %p1004_p2 }
  0x29   : > { %p1010_p9 = pnand %p1008_p7, %p1005_p5 }
  0x2b   : > { %1013 = shalt.err (!%p1010_p9)
}
  0x2c   : > { %s1014_s6 = scalar_lea.vmem %s179_s7, 16  ;;  %s1021_s10 = scalar_lea.vmem %s179_s7, 32 }
  0x2d   : > { %p1015_p11 = scmp.ne.s32.totalorder %s179_s7, %s1014_s6  ;;  %p1022_p8 = scmp.lt.s32.totalorder %s179_s7, %s179_s7 }
  0x2e   : > { %p1023_p6 = scmp.lt.s32.totalorder %s1021_s10, %s1014_s6 }
  0x2f   : > { %p1017_p1 = pnand %p1015_p11, %p1003_p0 }
  0x30   : > { %p1024_p4 = por %p1023_p6, %p1022_p8 }
  0x31   : > { %p1018_p3 = pneg %p1017_p1 }
  0x33   : > { %p1025_p10 = pnand %p1024_p4, %p1018_p3 }
  0x35   : > { %1028 = shalt.err (!%p1025_p10)
}
  0x36   : > { %892 = dma.hbm_to_vmem [thread:$0]  (!%p1341_p12), %s1813_s3, 16, %s179_s7, [#allocation7]  }
  0x37   : > { %p33_p1 = scmp.ge.s32.totalorder %s32_s9, 2  ;;  %s35_s12 = sadd.s32 1, %s1215_s24 }
  0x38   : > { %s44_s14 = sadd.s32 1, %s1199_s20  ;;  %p51_p3 = scmp.ne.s32.totalorder %s1199_s20, %s1195_s19 }
  0x39   : > { %s1846_s9 = smov (%p33_p1, %s32_s9), 0  ;;  %s1848_s12 = smov (!%p33_p1, %s35_s12), %s1215_s24 }
  0x3a   : > { %1814 = sst [smem:[#allocation18_spill]] %s1846_s9  ;;  %s40_s8 = ssub.s32 %s1211_s23, %s1846_s9 }
  0x3b   : > { %p1801_p4 = scmp.eq.s32.totalorder %s1219_s25, 0  ;;  %p37_p6 = scmp.ge.s32.totalorder %s1848_s12, 2 }
  0x3c   : > { %p1800_p8 = scmp.lt.s32.totalorder %s1219_s25, 4  ;;  %s189_s7 = sand.u32 1, %s1199_s20  }
  0x3d   : > { %p1375_p10 = por %p1801_p4, %p51_p3  ;;  %s1850_s12 = smov (%p37_p6, %s1848_s12), 0 }
  0x3e   : > { %1816 = sst [smem:[#allocation19_spill]] %s1850_s12  ;;  %s874_s27 = smul.u32 1568, %s189_s7 }
  0x3f   : > { %s1384_s6 = ssub.s32 %s1215_s24, %s1850_s12  ;;  %s194_s10 = smul.u32 196, %s1211_s23 }
  0x40   : > { %s41_s11 = sor.u32 %s40_s8, %s1384_s6  ;;  %p68_p12 = scmp.eq.s32.totalorder %s1384_s6, 0 }
  0x41   : > { %p42_p13 = scmp.eq.s32.totalorder %s41_s11, 0  ;;  %s875_s13 = smul.u32 392, %s1215_s24 }
  0x42   : > { %s193_s3 = scalar_lea.vmem [#allocation3], %s874_s27  ;;  %p1399_p0 = pnand %p1800_p8, %p1375_p10 }
  0x43   : > { %s202_s9 = sshll.u32 %s193_s3, 4  ;;  %s199_s15 = sadd.s32 %s875_s13, %s194_s10  ;;  %s1393_s9 = int_to_ptr.vmem [resolvable:$true] %s202_s9 }
  0x44   : > { %s1391_s30 = scalar_select %p42_p13, %s1199_s20, %s44_s14  }
  0x45   : > { %s861_s4 = sshll.u32 %s199_s15, 7  ;;  %s1408_s3 = scalar_lea.sflag [#allocation4], %s189_s7 }
  0x46   : > { %s1406_s8 = scalar_lea.hbm %s1785_s0, %s861_s4  ;;  %p1031_p5 = pneg %p1399_p0 }
  0x47   : > { %s1029_s15 = scalar_lea.hbm %s1406_s8, 25088  ;;  %s1034_s23 = scalar_lea.hbm %s1785_s0, 100352 }
  0x48   : > { %p1030_p2 = scmp.ne.s32.totalorder %s1406_s8, %s1029_s15  ;;  %p1035_p11 = scmp.lt.u32.totalorder %s1406_s8, %s1785_s0 }
  0x49   : > { %p1036_p1 = scmp.lt.u32.totalorder %s1034_s23, %s1029_s15  ;;  %p1038_p6 = scmp.lt.u32.totalorder %s1029_s15, %s1406_s8 }
  0x4a   : > { %p1032_p7 = pnand %p1031_p5, %p1030_p2 }
  0x4b   : > { %p1037_p3 = por %p1036_p1, %p1035_p11 }
  0x4c   : > { %p1033_p9 = pneg %p1032_p7 }
  0x4d   : > { %p1039_p10 = por %p1038_p6, %p1037_p3 }
  0x4f   : > { %p1040_p13 = pnand %p1039_p10, %p1033_p9 }
  0x51   : > { %1043 = shalt.err (!%p1040_p13)
}
  0x52   : > { %s1044_s7 = scalar_lea.vmem %s1393_s9, 25088  ;;  %s1222_s27 = smov [#allocation3]  }
  0x53   : > { %p1045_p2 = scmp.ne.s32.totalorder %s1393_s9, %s1044_s7  ;;  %s1049_s10 = sshll.u32 %s1222_s27, 4  ;;  %s1050_s10 = int_to_ptr.vmem [resolvable:$false] %s1049_s10 }
  0x54   : > { %s1051_s11 = scalar_lea.vmem %s1050_s10, 50176  ;;  %p1052_p4 = scmp.lt.s32.totalorder %s1393_s9, %s1050_s10 }
  0x55   : > { %p1047_p7 = pnand %p1045_p2, %p1031_p5  ;;  %p1053_p11 = scmp.lt.s32.totalorder %s1051_s11, %s1044_s7 }
  0x57   : > { %p1048_p8 = pneg %p1047_p7  ;;  %p1054_p1 = por %p1053_p11, %p1052_p4 }
  0x59   : > { %p1055_p3 = pnand %p1054_p1, %p1048_p8 }
  0x5b   : > { %1058 = shalt.err (!%p1055_p3)
}
  0x5c   : > { %s1223_s13 = smov 128   ;;  %s1224_s15 = smov 8  }
  0x5d   : > { %896 = dma.hbm_to_vmem [thread:$0]  (!%p1399_p0), %s1406_s8, 25088, %s1393_s9, %s1408_s3, %s1223_s13, %s1223_s13, %s1224_s15  }
  0x5e   : > { %s212_s14 = sand.u32 1, %s1219_s25   ;;  %s70_s22 = sadd.s32 1, %s1187_s17 }
  0x5f   : > { %p77_p4 = scmp.ne.s32.totalorder %s1187_s17, %s1183_s16  ;;  %p1818_p8 = scmp.eq.s32.totalorder %s1219_s25, 0 }
  0x60   : > { %s1443_s23 = scalar_select %p68_p12, %s1187_s17, %s70_s22  }
  0x61   : > { %p79_p5 = por %p77_p4, %p1818_p8  ;;  %p1819_p9 = scmp.eq.s32.totalorder %s1307_s26, 3 }
  0x62   : > { %s214_s18 = sand.u32 1, %s1187_s17   ;;  %s873_s7 = sshll.u32 %s1215_s24, 7 }
  0x63   : > { %p1449_p6 = por %p1819_p9, %p77_p4  ;;  %s862_s27 = sshll.u32 %s214_s18, 3 }
  0x64   : > { %s1458_s9 = scalar_lea.hbm %s1786_s1, %s873_s7  ;;  %p1821_p0 = scmp.lt.s32.totalorder %s1219_s25, 4 }
  0x65   : > { %s216_s6 = scalar_lea.vmem [#allocation6], %s862_s27  ;;  %s213_s3 = scalar_lea.sflag [#allocation7], %s212_s14 }
  0x66   : > { %p1462_p12 = pnand %p1821_p0, %p79_p5  ;;  %s224_s8 = sshll.u32 %s216_s6, 4  ;;  %s1466_s8 = int_to_ptr.vmem [resolvable:$true] %s224_s8 }
  0x67   : > { %s1059_s13 = scalar_lea.hbm %s1458_s9, 128  ;;  %s1064_s18 = scalar_lea.hbm %s1786_s1, 256 }
  0x68   : > { %p1060_p10 = scmp.ne.s32.totalorder %s1458_s9, %s1059_s13  ;;  %p1061_p13 = pneg %p1462_p12 }
  0x69   : > { %p1065_p11 = scmp.lt.u32.totalorder %s1458_s9, %s1786_s1  ;;  %p1066_p1 = scmp.lt.u32.totalorder %s1064_s18, %s1059_s13 }
  0x6a   : > { %p1062_p2 = pnand %p1061_p13, %p1060_p10  ;;  %p1068_p4 = scmp.lt.u32.totalorder %s1059_s13, %s1458_s9 }
  0x6b   : > { %p1067_p3 = por %p1066_p1, %p1065_p11 }
  0x6c   : > { %p1063_p7 = pneg %p1062_p2 }
  0x6d   : > { %p1069_p8 = por %p1068_p4, %p1067_p3 }
  0x6f   : > { %p1070_p5 = pnand %p1069_p8, %p1063_p7 }
  0x71   : > { %1073 = shalt.err (!%p1070_p5)
}
  0x72   : > { %s1074_s14 = scalar_lea.vmem %s1466_s8, 128  ;;  %s1225_s27 = smov [#allocation6]  }
  0x73   : > { %p1075_p9 = scmp.ne.s32.totalorder %s1466_s8, %s1074_s14  ;;  %s1079_s11 = sshll.u32 %s1225_s27, 4  ;;  %s1080_s11 = int_to_ptr.vmem [resolvable:$false] %s1079_s11 }
  0x74   : > { %s1081_s6 = scalar_lea.vmem %s1080_s11, 256  ;;  %p1082_p2 = scmp.lt.s32.totalorder %s1466_s8, %s1080_s11 }
  0x75   : > { %p1077_p0 = pnand %p1075_p9, %p1061_p13  ;;  %p1083_p11 = scmp.lt.s32.totalorder %s1081_s6, %s1074_s14 }
  0x77   : > { %p1078_p10 = pneg %p1077_p0  ;;  %p1084_p1 = por %p1083_p11, %p1082_p2 }
  0x79   : > { %p1085_p3 = pnand %p1084_p1, %p1078_p10 }
  0x7b   : > { %1088 = shalt.err (!%p1085_p3)
}
  0x7c   : > { %899 = dma.hbm_to_vmem [thread:$0]  (!%p1462_p12), %s1458_s9, 128, %s1466_s8, %s213_s3  }
  0x7d   : > { %p1823_p7 = scmp.ne.s32.totalorder %s1811_s5, 0 }
  0x7e   : > { %s235_s13 = sand.u32 (!%p1823_p7), 1, %s1195_s19   ;;  %p1824_p13 = scmp.ne.s32.totalorder (!%p1823_p7), %s1807_s28, 0 }
  0x7f   : > { %233 = sbr.rel (%p1823_p7) target bundleno = 792 (0x318), region = 36  ;;  %s236_s22 = scalar_lea.sflag (!%p1823_p7), [#allocation4], %s235_s13 }
  0x80   : > { %s876_s15 = smul.u32 (!%p1823_p7), 1568, %s235_s13 }
  0x82   : > { %s1496_s18 = scalar_lea.vmem (!%p1823_p7), [#allocation3], %s876_s15 }
  0x86   : > { %1162 = dma.done.wait (%p1824_p13), %s236_s22, 25088  }
  0x87   : > { %1164 = vsyncadd (%p1824_p13), %s236_s22, 4294942208  ;;  %s244_s12 = sand.u32 1, %s1307_s26   ;;  %s1504_s9 = sand.u32 1, %s1183_s16  }
  0x88   : > { %s866_s5 = sshll.u32 %s1504_s9, 3  ;;  %s245_s8 = scalar_lea.sflag [#allocation7], %s244_s12 }
  0x89   : > { %s1507_s3 = scalar_lea.vmem [#allocation6], %s866_s5  ;;  %p1825_p12 = scmp.ne.s32.totalorder %s1808_s29, 0 }
  0x8b   : > { %1166 = dma.done.wait (%p1825_p12), %s245_s8, 128  }
  0x8c   : > { %1168 = vsyncadd (%p1825_p12), %s245_s8, 4294967168  ;;  %p1826_p4 = scmp.eq.s32.totalorder %s1307_s26, 0 }
  0x8e   : > { %1170 = dma.done.wait (%p1826_p4), [#allocation7], 16   ;;  %p1827_p8 = pmov %p1826_p4 }
  0x8f   : > { %s280_s28 = scalar_lea.vmem [#allocation9], %s1504_s9  ;;  %p868_p5 = scmp.ne.s32.totalorder %s1203_s21, 0 }
  0x90   : > { %1172 = vsyncadd (%p1827_p8), [#allocation7], 4294967280  ;;  %v1226_v0 = vmov (!%p868_p5), 0.0  }
  0x91   : > { %285 = sbr.rel (%p868_p5) target bundleno = 152 (0x98), region = 52  ;;  %286 = vst [vmem:[#allocation2] sm:$0xff] (!%p868_p5), %v1226_v0 }
  0x98 PF: > { %v287_v1 = vld [vmem:[%s1496_s18] sm:$0xff]  ;;  %v288_v2 = vld [vmem:[%s1496_s18 + $0x8] sm:$0xff]  ;;  %v289_v3 = vld [vmem:[%s1496_s18 + $0x10] sm:$0xff]  ;;  %p869_p9 = scmp.ne.s32.totalorder %s1203_s21, 1 }
  0x99   : > { %v484_v4 = vadd.f32 %v288_v2, %v287_v1  ;;  %v290_v5 = vld [vmem:[%s1496_s18 + $0x18] sm:$0xff]  ;;  %v291_v7 = vld [vmem:[%s1496_s18 + $0x20] sm:$0xff]  ;;  %v292_v9 = vld [vmem:[%s1496_s18 + $0x28] sm:$0xff]  ;;  %vm701_vm0 = vcmask (!%p869_p9), 1043456   ;;  %vm703_vm1 = vcmask (!%p869_p9), 551936   ;;  %vm718_vm2 = vcmask (!%p869_p9), 11264  }
  0x9a   : > { %v293_v11 = vld [vmem:[%s1496_s18 + $0x30] sm:$0xff]  ;;  %v294_v13 = vld [vmem:[%s1496_s18 + $0x38] sm:$0xff]  ;;  %v295_v15 = vld [vmem:[%s1496_s18 + $0x40] sm:$0xff]  ;;  %vm729_vm3 = vcmask (!%p869_p9), 8192  }
  0x9b   : > { %v485_v6 = vadd.f32 %v484_v4, %v289_v3  ;;  %v296_v17 = vld [vmem:[%s1496_s18 + $0x48] sm:$0xff]  ;;  %v297_v19 = vld [vmem:[%s1496_s18 + $0x50] sm:$0xff]  ;;  %v298_v21 = vld [vmem:[%s1496_s18 + $0x58] sm:$0xff] }
  0x9c   : > { %v299_v23 = vld [vmem:[%s1496_s18 + $0x60] sm:$0xff]  ;;  %v300_v25 = vld [vmem:[%s1496_s18 + $0x68] sm:$0xff]  ;;  %v301_v27 = vld [vmem:[%s1496_s18 + $0x70] sm:$0xff] }
  0x9d   : > { %v486_v8 = vadd.f32 %v485_v6, %v290_v5  ;;  %v302_v29 = vld [vmem:[%s1496_s18 + $0x78] sm:$0xff]  ;;  %v303_v31 = vld [vmem:[%s1496_s18 + $0x80] sm:$0xff]  ;;  %v304_v33 = vld [vmem:[%s1496_s18 + $0x88] sm:$0xff] }
  0x9e   : > { %v305_v35 = vld [vmem:[%s1496_s18 + $0x90] sm:$0xff]  ;;  %v306_v37 = vld [vmem:[%s1496_s18 + $0x98] sm:$0xff]  ;;  %v307_v39 = vld [vmem:[%s1496_s18 + $0xa0] sm:$0xff] }
  0x9f   : > { %v487_v10 = vadd.f32 %v486_v8, %v291_v7  ;;  %v308_v41 = vld [vmem:[%s1496_s18 + $0xa8] sm:$0xff]  ;;  %v309_v43 = vld [vmem:[%s1496_s18 + $0xb0] sm:$0xff]  ;;  %v310_v45 = vld [vmem:[%s1496_s18 + $0xb8] sm:$0xff] }
  0xa0   : > { %v311_v47 = vld [vmem:[%s1496_s18 + $0xc0] sm:$0xff]  ;;  %v312_v49 = vld [vmem:[%s1496_s18 + $0xc8] sm:$0xff]  ;;  %v313_v51 = vld [vmem:[%s1496_s18 + $0xd0] sm:$0xff] }
  0xa1   : > { %v488_v12 = vadd.f32 %v487_v10, %v292_v9  ;;  %v314_v53 = vld [vmem:[%s1496_s18 + $0xd8] sm:$0xff]  ;;  %v315_v55 = vld [vmem:[%s1496_s18 + $0xe0] sm:$0xff]  ;;  %v316_v57 = vld [vmem:[%s1496_s18 + $0xe8] sm:$0xff] }
  0xa2   : > { %v317_v59 = vld [vmem:[%s1496_s18 + $0xf0] sm:$0xff]  ;;  %v318_v61 = vld [vmem:[%s1496_s18 + $0xf8] sm:$0xff]  ;;  %v319_v63 = vld [vmem:[%s1496_s18 + $0x100] sm:$0xff] }
  0xa3   : > { %v489_v14 = vadd.f32 %v488_v12, %v293_v11  ;;  %v320_v1 = vld [vmem:[%s1496_s18 + $0x108] sm:$0xff]  ;;  %v321_v3 = vld [vmem:[%s1496_s18 + $0x110] sm:$0xff]  ;;  %v322_v5 = vld [vmem:[%s1496_s18 + $0x118] sm:$0xff] }
  0xa4   : > { %v323_v7 = vld [vmem:[%s1496_s18 + $0x120] sm:$0xff]  ;;  %v324_v9 = vld [vmem:[%s1496_s18 + $0x128] sm:$0xff]  ;;  %v325_v11 = vld [vmem:[%s1496_s18 + $0x130] sm:$0xff] }
  0xa5   : > { %v490_v16 = vadd.f32 %v489_v14, %v294_v13  ;;  %v326_v13 = vld [vmem:[%s1496_s18 + $0x138] sm:$0xff] }
  0xa7   : > { %v491_v18 = vadd.f32 %v490_v16, %v295_v15  ;;  %v327_v15 = vld [vmem:[%s1496_s18 + $0x140] sm:$0xff] }
  0xa9   : > { %v492_v20 = vadd.f32 %v491_v18, %v296_v17  ;;  %v328_v17 = vld [vmem:[%s1496_s18 + $0x148] sm:$0xff] }
  0xab   : > { %v493_v22 = vadd.f32 %v492_v20, %v297_v19  ;;  %v329_v19 = vld [vmem:[%s1496_s18 + $0x150] sm:$0xff] }
  0xad   : > { %v494_v24 = vadd.f32 %v493_v22, %v298_v21  ;;  %v330_v21 = vld [vmem:[%s1496_s18 + $0x158] sm:$0xff] }
  0xaf   : > { %v495_v26 = vadd.f32 %v494_v24, %v299_v23  ;;  %v331_v23 = vld [vmem:[%s1496_s18 + $0x160] sm:$0xff] }
  0xb1   : > { %v496_v28 = vadd.f32 %v495_v26, %v300_v25  ;;  %v332_v25 = vld [vmem:[%s1496_s18 + $0x168] sm:$0xff] }
  0xb3   : > { %v497_v30 = vadd.f32 %v496_v28, %v301_v27  ;;  %v333_v27 = vld [vmem:[%s1496_s18 + $0x170] sm:$0xff] }
  0xb5   : > { %v498_v32 = vadd.f32 %v497_v30, %v302_v29  ;;  %v334_v29 = vld [vmem:[%s1496_s18 + $0x178] sm:$0xff] }
  0xb7   : > { %v499_v34 = vadd.f32 %v498_v32, %v303_v31  ;;  %v335_v31 = vld [vmem:[%s1496_s18 + $0x180] sm:$0xff] }
  0xb9   : > { %v500_v36 = vadd.f32 %v499_v34, %v304_v33  ;;  %v336_v33 = vld [vmem:[%s1496_s18 + $0x188] sm:$0xff] }
  0xbb   : > { %v501_v38 = vadd.f32 %v500_v36, %v305_v35  ;;  %v337_v35 = vld [vmem:[%s1496_s18 + $0x190] sm:$0xff] }
  0xbd   : > { %v502_v40 = vadd.f32 %v501_v38, %v306_v37  ;;  %v338_v37 = vld [vmem:[%s1496_s18 + $0x198] sm:$0xff] }
  0xbf   : > { %v503_v42 = vadd.f32 %v502_v40, %v307_v39  ;;  %v339_v39 = vld [vmem:[%s1496_s18 + $0x1a0] sm:$0xff] }
  0xc1   : > { %v504_v44 = vadd.f32 %v503_v42, %v308_v41  ;;  %v340_v41 = vld [vmem:[%s1496_s18 + $0x1a8] sm:$0xff] }
  0xc3   : > { %v505_v46 = vadd.f32 %v504_v44, %v309_v43  ;;  %v341_v43 = vld [vmem:[%s1496_s18 + $0x1b0] sm:$0xff] }
  0xc5   : > { %v506_v48 = vadd.f32 %v505_v46, %v310_v45  ;;  %v342_v45 = vld [vmem:[%s1496_s18 + $0x1b8] sm:$0xff] }
  0xc7   : > { %v507_v50 = vadd.f32 %v506_v48, %v311_v47  ;;  %v343_v47 = vld [vmem:[%s1496_s18 + $0x1c0] sm:$0xff] }
  0xc9   : > { %v508_v52 = vadd.f32 %v507_v50, %v312_v49  ;;  %v344_v49 = vld [vmem:[%s1496_s18 + $0x1c8] sm:$0xff] }
  0xcb   : > { %v509_v54 = vadd.f32 %v508_v52, %v313_v51  ;;  %v345_v51 = vld [vmem:[%s1496_s18 + $0x1d0] sm:$0xff] }
  0xcd   : > { %v510_v56 = vadd.f32 %v509_v54, %v314_v53  ;;  %v346_v53 = vld [vmem:[%s1496_s18 + $0x1d8] sm:$0xff] }
  0xcf   : > { %v511_v58 = vadd.f32 %v510_v56, %v315_v55  ;;  %v347_v55 = vld [vmem:[%s1496_s18 + $0x1e0] sm:$0xff] }
  0xd1   : > { %v512_v60 = vadd.f32 %v511_v58, %v316_v57  ;;  %v348_v57 = vld [vmem:[%s1496_s18 + $0x1e8] sm:$0xff] }
  0xd3   : > { %v513_v62 = vadd.f32 %v512_v60, %v317_v59  ;;  %v349_v59 = vld [vmem:[%s1496_s18 + $0x1f0] sm:$0xff] }
  0xd5   : > { %v514_v0 = vadd.f32 %v513_v62, %v318_v61  ;;  %v350_v61 = vld [vmem:[%s1496_s18 + $0x1f8] sm:$0xff] }
  0xd7   : > { %v515_v2 = vadd.f32 %v514_v0, %v319_v63  ;;  %v351_v63 = vld [vmem:[%s1496_s18 + $0x200] sm:$0xff] }
  0xd9   : > { %v516_v4 = vadd.f32 %v515_v2, %v320_v1  ;;  %v352_v1 = vld [vmem:[%s1496_s18 + $0x208] sm:$0xff] }
  0xdb   : > { %v517_v6 = vadd.f32 %v516_v4, %v321_v3  ;;  %v353_v3 = vld [vmem:[%s1496_s18 + $0x210] sm:$0xff] }
  0xdd   : > { %v518_v8 = vadd.f32 %v517_v6, %v322_v5  ;;  %v354_v5 = vld [vmem:[%s1496_s18 + $0x218] sm:$0xff] }
  0xdf   : > { %v519_v10 = vadd.f32 %v518_v8, %v323_v7  ;;  %v355_v7 = vld [vmem:[%s1496_s18 + $0x220] sm:$0xff] }
  0xe1   : > { %v520_v12 = vadd.f32 %v519_v10, %v324_v9  ;;  %v356_v9 = vld [vmem:[%s1496_s18 + $0x228] sm:$0xff] }
  0xe3   : > { %v521_v14 = vadd.f32 %v520_v12, %v325_v11  ;;  %v357_v11 = vld [vmem:[%s1496_s18 + $0x230] sm:$0xff] }
  0xe5   : > { %v522_v16 = vadd.f32 %v521_v14, %v326_v13  ;;  %v358_v13 = vld [vmem:[%s1496_s18 + $0x238] sm:$0xff] }
  0xe7   : > { %v523_v18 = vadd.f32 %v522_v16, %v327_v15  ;;  %v359_v15 = vld [vmem:[%s1496_s18 + $0x240] sm:$0xff] }
  0xe9   : > { %v524_v20 = vadd.f32 %v523_v18, %v328_v17  ;;  %v360_v17 = vld [vmem:[%s1496_s18 + $0x248] sm:$0xff] }
  0xeb   : > { %v525_v22 = vadd.f32 %v524_v20, %v329_v19  ;;  %v361_v19 = vld [vmem:[%s1496_s18 + $0x250] sm:$0xff] }
  0xed   : > { %v526_v24 = vadd.f32 %v525_v22, %v330_v21  ;;  %v362_v21 = vld [vmem:[%s1496_s18 + $0x258] sm:$0xff] }
  0xef   : > { %v527_v26 = vadd.f32 %v526_v24, %v331_v23  ;;  %v363_v23 = vld [vmem:[%s1496_s18 + $0x260] sm:$0xff] }
  0xf1   : > { %v528_v28 = vadd.f32 %v527_v26, %v332_v25  ;;  %v364_v25 = vld [vmem:[%s1496_s18 + $0x268] sm:$0xff] }
  0xf3   : > { %v529_v30 = vadd.f32 %v528_v28, %v333_v27  ;;  %v365_v27 = vld [vmem:[%s1496_s18 + $0x270] sm:$0xff] }
  0xf5   : > { %v530_v32 = vadd.f32 %v529_v30, %v334_v29  ;;  %v366_v29 = vld [vmem:[%s1496_s18 + $0x278] sm:$0xff] }
  0xf7   : > { %v531_v34 = vadd.f32 %v530_v32, %v335_v31  ;;  %v367_v31 = vld [vmem:[%s1496_s18 + $0x280] sm:$0xff] }
  0xf9   : > { %v532_v36 = vadd.f32 %v531_v34, %v336_v33  ;;  %v368_v33 = vld [vmem:[%s1496_s18 + $0x288] sm:$0xff] }
  0xfb   : > { %v533_v38 = vadd.f32 %v532_v36, %v337_v35  ;;  %v369_v35 = vld [vmem:[%s1496_s18 + $0x290] sm:$0xff] }
  0xfd   : > { %v534_v40 = vadd.f32 %v533_v38, %v338_v37  ;;  %v370_v37 = vld [vmem:[%s1496_s18 + $0x298] sm:$0xff] }
  0xff   : > { %v535_v42 = vadd.f32 %v534_v40, %v339_v39  ;;  %v371_v39 = vld [vmem:[%s1496_s18 + $0x2a0] sm:$0xff] }
 0x101   : > { %v536_v44 = vadd.f32 %v535_v42, %v340_v41  ;;  %v372_v41 = vld [vmem:[%s1496_s18 + $0x2a8] sm:$0xff] }
 0x103   : > { %v537_v46 = vadd.f32 %v536_v44, %v341_v43  ;;  %v373_v43 = vld [vmem:[%s1496_s18 + $0x2b0] sm:$0xff] }
 0x105   : > { %v538_v48 = vadd.f32 %v537_v46, %v342_v45  ;;  %v374_v45 = vld [vmem:[%s1496_s18 + $0x2b8] sm:$0xff] }
 0x107   : > { %v539_v50 = vadd.f32 %v538_v48, %v343_v47  ;;  %v375_v47 = vld [vmem:[%s1496_s18 + $0x2c0] sm:$0xff] }
 0x109   : > { %v540_v52 = vadd.f32 %v539_v50, %v344_v49  ;;  %v376_v49 = vld [vmem:[%s1496_s18 + $0x2c8] sm:$0xff] }
 0x10b   : > { %v541_v54 = vadd.f32 %v540_v52, %v345_v51  ;;  %v377_v51 = vld [vmem:[%s1496_s18 + $0x2d0] sm:$0xff] }
 0x10d   : > { %v542_v56 = vadd.f32 %v541_v54, %v346_v53  ;;  %v378_v53 = vld [vmem:[%s1496_s18 + $0x2d8] sm:$0xff] }
 0x10f   : > { %v543_v58 = vadd.f32 %v542_v56, %v347_v55  ;;  %v379_v55 = vld [vmem:[%s1496_s18 + $0x2e0] sm:$0xff] }
 0x111   : > { %v544_v60 = vadd.f32 %v543_v58, %v348_v57  ;;  %v380_v57 = vld [vmem:[%s1496_s18 + $0x2e8] sm:$0xff] }
 0x113   : > { %v545_v62 = vadd.f32 %v544_v60, %v349_v59  ;;  %v381_v59 = vld [vmem:[%s1496_s18 + $0x2f0] sm:$0xff] }
 0x115   : > { %v546_v0 = vadd.f32 %v545_v62, %v350_v61  ;;  %v382_v61 = vld [vmem:[%s1496_s18 + $0x2f8] sm:$0xff] }
 0x117   : > { %v547_v2 = vadd.f32 %v546_v0, %v351_v63  ;;  %v383_v63 = vld [vmem:[%s1496_s18 + $0x300] sm:$0xff] }
 0x119   : > { %v548_v4 = vadd.f32 %v547_v2, %v352_v1  ;;  %v384_v1 = vld [vmem:[%s1496_s18 + $0x308] sm:$0xff] }
 0x11b   : > { %v549_v6 = vadd.f32 %v548_v4, %v353_v3  ;;  %v385_v3 = vld [vmem:[%s1496_s18 + $0x310] sm:$0xff] }
 0x11d   : > { %v550_v8 = vadd.f32 %v549_v6, %v354_v5  ;;  %v386_v5 = vld [vmem:[%s1496_s18 + $0x318] sm:$0xff] }
 0x11f   : > { %v551_v10 = vadd.f32 %v550_v8, %v355_v7  ;;  %v387_v7 = vld [vmem:[%s1496_s18 + $0x320] sm:$0xff] }
 0x121   : > { %v552_v12 = vadd.f32 %v551_v10, %v356_v9  ;;  %v388_v9 = vld [vmem:[%s1496_s18 + $0x328] sm:$0xff] }
 0x123   : > { %v553_v14 = vadd.f32 %v552_v12, %v357_v11  ;;  %v389_v11 = vld [vmem:[%s1496_s18 + $0x330] sm:$0xff] }
 0x125   : > { %v554_v16 = vadd.f32 %v553_v14, %v358_v13  ;;  %v390_v13 = vld [vmem:[%s1496_s18 + $0x338] sm:$0xff] }
 0x127   : > { %v555_v18 = vadd.f32 %v554_v16, %v359_v15  ;;  %v391_v15 = vld [vmem:[%s1496_s18 + $0x340] sm:$0xff] }
 0x129   : > { %v556_v20 = vadd.f32 %v555_v18, %v360_v17  ;;  %v392_v17 = vld [vmem:[%s1496_s18 + $0x348] sm:$0xff] }
 0x12b   : > { %v557_v22 = vadd.f32 %v556_v20, %v361_v19  ;;  %v393_v19 = vld [vmem:[%s1496_s18 + $0x350] sm:$0xff] }
 0x12d   : > { %v558_v24 = vadd.f32 %v557_v22, %v362_v21  ;;  %v394_v21 = vld [vmem:[%s1496_s18 + $0x358] sm:$0xff] }
 0x12f   : > { %v559_v26 = vadd.f32 %v558_v24, %v363_v23  ;;  %v395_v23 = vld [vmem:[%s1496_s18 + $0x360] sm:$0xff] }
 0x131   : > { %v560_v28 = vadd.f32 %v559_v26, %v364_v25  ;;  %v396_v25 = vld [vmem:[%s1496_s18 + $0x368] sm:$0xff] }
 0x133   : > { %v561_v30 = vadd.f32 %v560_v28, %v365_v27  ;;  %v397_v27 = vld [vmem:[%s1496_s18 + $0x370] sm:$0xff] }
 0x135   : > { %v562_v32 = vadd.f32 %v561_v30, %v366_v29  ;;  %v398_v29 = vld [vmem:[%s1496_s18 + $0x378] sm:$0xff] }
 0x137   : > { %v563_v34 = vadd.f32 %v562_v32, %v367_v31  ;;  %v399_v31 = vld [vmem:[%s1496_s18 + $0x380] sm:$0xff] }
 0x139   : > { %v564_v36 = vadd.f32 %v563_v34, %v368_v33  ;;  %v400_v33 = vld [vmem:[%s1496_s18 + $0x388] sm:$0xff] }
 0x13b   : > { %v565_v38 = vadd.f32 %v564_v36, %v369_v35  ;;  %v401_v35 = vld [vmem:[%s1496_s18 + $0x390] sm:$0xff] }
 0x13d   : > { %v566_v40 = vadd.f32 %v565_v38, %v370_v37  ;;  %v402_v37 = vld [vmem:[%s1496_s18 + $0x398] sm:$0xff] }
 0x13f   : > { %v567_v42 = vadd.f32 %v566_v40, %v371_v39  ;;  %v403_v39 = vld [vmem:[%s1496_s18 + $0x3a0] sm:$0xff] }
 0x141   : > { %v568_v44 = vadd.f32 %v567_v42, %v372_v41  ;;  %v404_v41 = vld [vmem:[%s1496_s18 + $0x3a8] sm:$0xff] }
 0x143   : > { %v569_v46 = vadd.f32 %v568_v44, %v373_v43  ;;  %v405_v43 = vld [vmem:[%s1496_s18 + $0x3b0] sm:$0xff] }
 0x145   : > { %v570_v48 = vadd.f32 %v569_v46, %v374_v45  ;;  %v406_v45 = vld [vmem:[%s1496_s18 + $0x3b8] sm:$0xff] }
 0x147   : > { %v571_v50 = vadd.f32 %v570_v48, %v375_v47  ;;  %v407_v47 = vld [vmem:[%s1496_s18 + $0x3c0] sm:$0xff] }
 0x149   : > { %v572_v52 = vadd.f32 %v571_v50, %v376_v49  ;;  %v408_v49 = vld [vmem:[%s1496_s18 + $0x3c8] sm:$0xff] }
 0x14b   : > { %v573_v54 = vadd.f32 %v572_v52, %v377_v51  ;;  %v409_v51 = vld [vmem:[%s1496_s18 + $0x3d0] sm:$0xff] }
 0x14d   : > { %v574_v56 = vadd.f32 %v573_v54, %v378_v53  ;;  %v410_v53 = vld [vmem:[%s1496_s18 + $0x3d8] sm:$0xff] }
 0x14f   : > { %v575_v58 = vadd.f32 %v574_v56, %v379_v55  ;;  %v411_v55 = vld [vmem:[%s1496_s18 + $0x3e0] sm:$0xff] }
 0x151   : > { %v576_v60 = vadd.f32 %v575_v58, %v380_v57  ;;  %v412_v57 = vld [vmem:[%s1496_s18 + $0x3e8] sm:$0xff] }
 0x153   : > { %v577_v62 = vadd.f32 %v576_v60, %v381_v59  ;;  %v413_v59 = vld [vmem:[%s1496_s18 + $0x3f0] sm:$0xff] }
 0x155   : > { %v578_v0 = vadd.f32 %v577_v62, %v382_v61  ;;  %v414_v61 = vld [vmem:[%s1496_s18 + $0x3f8] sm:$0xff] }
 0x157   : > { %v579_v2 = vadd.f32 %v578_v0, %v383_v63  ;;  %v415_v63 = vld [vmem:[%s1496_s18 + $0x400] sm:$0xff] }
 0x159   : > { %v580_v4 = vadd.f32 %v579_v2, %v384_v1  ;;  %v416_v1 = vld [vmem:[%s1496_s18 + $0x408] sm:$0xff] }
 0x15b   : > { %v581_v6 = vadd.f32 %v580_v4, %v385_v3  ;;  %v417_v3 = vld [vmem:[%s1496_s18 + $0x410] sm:$0xff] }
 0x15d   : > { %v582_v8 = vadd.f32 %v581_v6, %v386_v5  ;;  %v418_v5 = vld [vmem:[%s1496_s18 + $0x418] sm:$0xff] }
 0x15f   : > { %v583_v10 = vadd.f32 %v582_v8, %v387_v7  ;;  %v419_v7 = vld [vmem:[%s1496_s18 + $0x420] sm:$0xff] }
 0x161   : > { %v584_v12 = vadd.f32 %v583_v10, %v388_v9  ;;  %v420_v9 = vld [vmem:[%s1496_s18 + $0x428] sm:$0xff] }
 0x163   : > { %v585_v14 = vadd.f32 %v584_v12, %v389_v11  ;;  %v421_v11 = vld [vmem:[%s1496_s18 + $0x430] sm:$0xff] }
 0x165   : > { %v586_v16 = vadd.f32 %v585_v14, %v390_v13  ;;  %v422_v13 = vld [vmem:[%s1496_s18 + $0x438] sm:$0xff] }
 0x167   : > { %v587_v18 = vadd.f32 %v586_v16, %v391_v15  ;;  %v423_v15 = vld [vmem:[%s1496_s18 + $0x440] sm:$0xff] }
 0x169   : > { %v588_v20 = vadd.f32 %v587_v18, %v392_v17  ;;  %v424_v17 = vld [vmem:[%s1496_s18 + $0x448] sm:$0xff] }
 0x16b   : > { %v589_v22 = vadd.f32 %v588_v20, %v393_v19  ;;  %v425_v19 = vld [vmem:[%s1496_s18 + $0x450] sm:$0xff] }
 0x16d   : > { %v590_v24 = vadd.f32 %v589_v22, %v394_v21  ;;  %v426_v21 = vld [vmem:[%s1496_s18 + $0x458] sm:$0xff] }
 0x16f   : > { %v591_v26 = vadd.f32 %v590_v24, %v395_v23  ;;  %v427_v23 = vld [vmem:[%s1496_s18 + $0x460] sm:$0xff] }
 0x171   : > { %v592_v28 = vadd.f32 %v591_v26, %v396_v25  ;;  %v428_v25 = vld [vmem:[%s1496_s18 + $0x468] sm:$0xff] }
 0x173   : > { %v593_v30 = vadd.f32 %v592_v28, %v397_v27  ;;  %v429_v27 = vld [vmem:[%s1496_s18 + $0x470] sm:$0xff] }
 0x175   : > { %v594_v32 = vadd.f32 %v593_v30, %v398_v29  ;;  %v430_v29 = vld [vmem:[%s1496_s18 + $0x478] sm:$0xff] }
 0x177   : > { %v595_v34 = vadd.f32 %v594_v32, %v399_v31  ;;  %v431_v31 = vld [vmem:[%s1496_s18 + $0x480] sm:$0xff] }
 0x179   : > { %v596_v36 = vadd.f32 %v595_v34, %v400_v33  ;;  %v432_v33 = vld [vmem:[%s1496_s18 + $0x488] sm:$0xff] }
 0x17b   : > { %v597_v38 = vadd.f32 %v596_v36, %v401_v35  ;;  %v433_v35 = vld [vmem:[%s1496_s18 + $0x490] sm:$0xff] }
 0x17d   : > { %v598_v40 = vadd.f32 %v597_v38, %v402_v37  ;;  %v434_v37 = vld [vmem:[%s1496_s18 + $0x498] sm:$0xff] }
 0x17f   : > { %v599_v42 = vadd.f32 %v598_v40, %v403_v39  ;;  %v435_v39 = vld [vmem:[%s1496_s18 + $0x4a0] sm:$0xff] }
 0x181   : > { %v600_v44 = vadd.f32 %v599_v42, %v404_v41  ;;  %v436_v41 = vld [vmem:[%s1496_s18 + $0x4a8] sm:$0xff] }
 0x183   : > { %v601_v46 = vadd.f32 %v600_v44, %v405_v43  ;;  %v437_v43 = vld [vmem:[%s1496_s18 + $0x4b0] sm:$0xff] }
 0x185   : > { %v602_v48 = vadd.f32 %v601_v46, %v406_v45  ;;  %v438_v45 = vld [vmem:[%s1496_s18 + $0x4b8] sm:$0xff] }
 0x187   : > { %v603_v50 = vadd.f32 %v602_v48, %v407_v47  ;;  %v439_v47 = vld [vmem:[%s1496_s18 + $0x4c0] sm:$0xff] }
 0x189   : > { %v604_v52 = vadd.f32 %v603_v50, %v408_v49  ;;  %v440_v49 = vld [vmem:[%s1496_s18 + $0x4c8] sm:$0xff] }
 0x18b   : > { %v605_v54 = vadd.f32 %v604_v52, %v409_v51  ;;  %v441_v51 = vld [vmem:[%s1496_s18 + $0x4d0] sm:$0xff] }
 0x18d   : > { %v606_v56 = vadd.f32 %v605_v54, %v410_v53  ;;  %v442_v53 = vld [vmem:[%s1496_s18 + $0x4d8] sm:$0xff] }
 0x18f   : > { %v607_v58 = vadd.f32 %v606_v56, %v411_v55  ;;  %v443_v55 = vld [vmem:[%s1496_s18 + $0x4e0] sm:$0xff] }
 0x191   : > { %v608_v60 = vadd.f32 %v607_v58, %v412_v57  ;;  %v444_v57 = vld [vmem:[%s1496_s18 + $0x4e8] sm:$0xff] }
 0x193   : > { %v609_v62 = vadd.f32 %v608_v60, %v413_v59  ;;  %v445_v59 = vld [vmem:[%s1496_s18 + $0x4f0] sm:$0xff] }
 0x195   : > { %v610_v0 = vadd.f32 %v609_v62, %v414_v61  ;;  %v446_v61 = vld [vmem:[%s1496_s18 + $0x4f8] sm:$0xff] }
 0x197   : > { %v611_v2 = vadd.f32 %v610_v0, %v415_v63  ;;  %v447_v63 = vld [vmem:[%s1496_s18 + $0x500] sm:$0xff] }
 0x199   : > { %v612_v4 = vadd.f32 %v611_v2, %v416_v1  ;;  %v448_v1 = vld [vmem:[%s1496_s18 + $0x508] sm:$0xff] }
 0x19b   : > { %v613_v6 = vadd.f32 %v612_v4, %v417_v3  ;;  %v449_v3 = vld [vmem:[%s1496_s18 + $0x510] sm:$0xff] }
 0x19d   : > { %v614_v8 = vadd.f32 %v613_v6, %v418_v5  ;;  %v450_v5 = vld [vmem:[%s1496_s18 + $0x518] sm:$0xff] }
 0x19f   : > { %v615_v10 = vadd.f32 %v614_v8, %v419_v7  ;;  %v451_v7 = vld [vmem:[%s1496_s18 + $0x520] sm:$0xff] }
 0x1a1   : > { %v616_v12 = vadd.f32 %v615_v10, %v420_v9  ;;  %v452_v9 = vld [vmem:[%s1496_s18 + $0x528] sm:$0xff] }
 0x1a3   : > { %v617_v14 = vadd.f32 %v616_v12, %v421_v11  ;;  %v453_v11 = vld [vmem:[%s1496_s18 + $0x530] sm:$0xff] }
 0x1a5   : > { %v618_v16 = vadd.f32 %v617_v14, %v422_v13  ;;  %v454_v13 = vld [vmem:[%s1496_s18 + $0x538] sm:$0xff] }
 0x1a7   : > { %v619_v18 = vadd.f32 %v618_v16, %v423_v15  ;;  %v455_v15 = vld [vmem:[%s1496_s18 + $0x540] sm:$0xff] }
 0x1a9   : > { %v620_v20 = vadd.f32 %v619_v18, %v424_v17  ;;  %v456_v17 = vld [vmem:[%s1496_s18 + $0x548] sm:$0xff] }
 0x1ab   : > { %v621_v22 = vadd.f32 %v620_v20, %v425_v19  ;;  %v457_v19 = vld [vmem:[%s1496_s18 + $0x550] sm:$0xff] }
 0x1ad   : > { %v622_v24 = vadd.f32 %v621_v22, %v426_v21  ;;  %v458_v21 = vld [vmem:[%s1496_s18 + $0x558] sm:$0xff] }
 0x1af   : > { %v623_v26 = vadd.f32 %v622_v24, %v427_v23  ;;  %v459_v23 = vld [vmem:[%s1496_s18 + $0x560] sm:$0xff] }
 0x1b1   : > { %v624_v28 = vadd.f32 %v623_v26, %v428_v25  ;;  %v460_v25 = vld [vmem:[%s1496_s18 + $0x568] sm:$0xff] }
 0x1b3   : > { %v625_v30 = vadd.f32 %v624_v28, %v429_v27  ;;  %v461_v27 = vld [vmem:[%s1496_s18 + $0x570] sm:$0xff] }
 0x1b5   : > { %v626_v32 = vadd.f32 %v625_v30, %v430_v29  ;;  %v462_v29 = vld [vmem:[%s1496_s18 + $0x578] sm:$0xff] }
 0x1b7   : > { %v627_v34 = vadd.f32 %v626_v32, %v431_v31  ;;  %v463_v31 = vld [vmem:[%s1496_s18 + $0x580] sm:$0xff] }
 0x1b9   : > { %v628_v36 = vadd.f32 %v627_v34, %v432_v33  ;;  %v464_v33 = vld [vmem:[%s1496_s18 + $0x588] sm:$0xff] }
 0x1bb   : > { %v629_v38 = vadd.f32 %v628_v36, %v433_v35  ;;  %v465_v35 = vld [vmem:[%s1496_s18 + $0x590] sm:$0xff] }
 0x1bd   : > { %v630_v40 = vadd.f32 %v629_v38, %v434_v37  ;;  %v466_v37 = vld [vmem:[%s1496_s18 + $0x598] sm:$0xff] }
 0x1bf   : > { %v631_v42 = vadd.f32 %v630_v40, %v435_v39  ;;  %v467_v39 = vld [vmem:[%s1496_s18 + $0x5a0] sm:$0xff] }
 0x1c1   : > { %v632_v44 = vadd.f32 %v631_v42, %v436_v41  ;;  %v468_v41 = vld [vmem:[%s1496_s18 + $0x5a8] sm:$0xff] }
 0x1c3   : > { %v633_v46 = vadd.f32 %v632_v44, %v437_v43  ;;  %v469_v43 = vld [vmem:[%s1496_s18 + $0x5b0] sm:$0xff] }
 0x1c5   : > { %v634_v48 = vadd.f32 %v633_v46, %v438_v45  ;;  %v470_v45 = vld [vmem:[%s1496_s18 + $0x5b8] sm:$0xff] }
 0x1c7   : > { %v635_v50 = vadd.f32 %v634_v48, %v439_v47  ;;  %v471_v47 = vld [vmem:[%s1496_s18 + $0x5c0] sm:$0xff] }
 0x1c9   : > { %v636_v52 = vadd.f32 %v635_v50, %v440_v49  ;;  %v472_v49 = vld [vmem:[%s1496_s18 + $0x5c8] sm:$0xff] }
 0x1cb   : > { %v637_v54 = vadd.f32 %v636_v52, %v441_v51  ;;  %v473_v51 = vld [vmem:[%s1496_s18 + $0x5d0] sm:$0xff] }
 0x1cd   : > { %v638_v56 = vadd.f32 %v637_v54, %v442_v53  ;;  %v474_v53 = vld [vmem:[%s1496_s18 + $0x5d8] sm:$0xff] }
 0x1cf   : > { %v639_v58 = vadd.f32 %v638_v56, %v443_v55  ;;  %v475_v55 = vld [vmem:[%s1496_s18 + $0x5e0] sm:$0xff] }
 0x1d1   : > { %v640_v60 = vadd.f32 %v639_v58, %v444_v57  ;;  %v476_v57 = vld [vmem:[%s1496_s18 + $0x5e8] sm:$0xff] }
 0x1d3   : > { %v641_v62 = vadd.f32 %v640_v60, %v445_v59  ;;  %v477_v59 = vld [vmem:[%s1496_s18 + $0x5f0] sm:$0xff] }
 0x1d5   : > { %v642_v0 = vadd.f32 %v641_v62, %v446_v61  ;;  %v478_v61 = vld [vmem:[%s1496_s18 + $0x5f8] sm:$0xff] }
 0x1d7   : > { %v643_v2 = vadd.f32 %v642_v0, %v447_v63  ;;  %v479_v63 = vld [vmem:[%s1496_s18 + $0x600] sm:$0xff] }
 0x1d9   : > { %v644_v4 = vadd.f32 %v643_v2, %v448_v1  ;;  %v480_v1 = vld [vmem:[%s1496_s18 + $0x608] sm:$0xff] }
 0x1db   : > { %v645_v6 = vadd.f32 %v644_v4, %v449_v3  ;;  %v481_v3 = vld [vmem:[%s1496_s18 + $0x610] sm:$0xff] }
 0x1dd   : > { %v646_v8 = vadd.f32 %v645_v6, %v450_v5  ;;  %v482_v5 = vld [vmem:[%s1496_s18 + $0x618] sm:$0xff] }
 0x1df   : > { %v647_v10 = vadd.f32 %v646_v8, %v451_v7  ;;  %v483_v7 = vld [vmem:[#allocation2] sm:$0xff] }
 0x1e1   : > { %v648_v12 = vadd.f32 %v647_v10, %v452_v9 }
 0x1e3   : > { %v649_v14 = vadd.f32 %v648_v12, %v453_v11  ;;  %v697_v11 = vld [vmem:[%s1507_s3] sm:$0xff] (!%p869_p9) }
 0x1e4   : > { %v699_v12 = vcombine.high (!%p869_p9), %v697_v11, %v697_v11 }
 0x1e5   : > { %v650_v16 = vadd.f32 %v649_v14, %v454_v13  ;;  %v702_v13 = vsel (!%p869_p9), %vm701_vm0, %v697_v11, 0.0 }
 0x1e6   : > { %v704_v14 = vsel (!%p869_p9), %vm703_vm1, %v699_v12, 0.0 }
 0x1e7   : > { %v651_v18 = vadd.f32 %v650_v16, %v455_v15  ;;  %v705_v15 = vadd.f32 (!%p869_p9), %v704_v14, %v702_v13 }
 0x1e9   : > { %v652_v20 = vadd.f32 %v651_v18, %v456_v17 }
 0x1eb   : > { %v653_v22 = vadd.f32 %v652_v20, %v457_v19 }
 0x1ed   : > { %v654_v24 = vadd.f32 %v653_v22, %v458_v21 }
 0x1ef   : > { %v655_v26 = vadd.f32 %v654_v24, %v459_v23 }
 0x1f1   : > { %v656_v28 = vadd.f32 %v655_v26, %v460_v25  ;;  %v709_v26 = vld [vmem:[%s1787_s2] sm:$0x1f] (!%p869_p9) }
 0x1f3   : > { %v657_v30 = vadd.f32 %v656_v28, %v461_v27 }
 0x1f5   : > { %v658_v32 = vadd.f32 %v657_v30, %v462_v29 }
 0x1f7   : > { %v659_v34 = vadd.f32 %v658_v32, %v463_v31 }
 0x1f9   : > { %v660_v36 = vadd.f32 %v659_v34, %v464_v33 }
 0x1fb   : > { %v661_v38 = vadd.f32 %v660_v36, %v465_v35 }
 0x1fd   : > { %v662_v40 = vadd.f32 %v661_v38, %v466_v37 }
 0x1ff   : > { %v663_v42 = vadd.f32 %v662_v40, %v467_v39  ;;  %v727_v39 = vld [vmem:[#allocation8] sm:$0x1] (!%p869_p9) }
 0x201   : > { %v664_v44 = vadd.f32 %v663_v42, %v468_v41 }
 0x203   : > { %v665_v46 = vadd.f32 %v664_v44, %v469_v43 }
 0x205   : > { %v666_v48 = vadd.f32 %v665_v46, %v470_v45 }
 0x207   : > { %v667_v50 = vadd.f32 %v666_v48, %v471_v47 }
 0x209   : > { %v668_v52 = vadd.f32 %v667_v50, %v472_v49 }
 0x20b   : > { %v669_v54 = vadd.f32 %v668_v52, %v473_v51 }
 0x20d   : > { %v670_v56 = vadd.f32 %v669_v54, %v474_v53 }
 0x20f   : > { %v671_v58 = vadd.f32 %v670_v56, %v475_v55 }
 0x211   : > { %v672_v60 = vadd.f32 %v671_v58, %v476_v57 }
 0x213   : > { %v673_v62 = vadd.f32 %v672_v60, %v477_v59 }
 0x215   : > { %v674_v0 = vadd.f32 %v673_v62, %v478_v61 }
 0x217   : > { %v675_v2 = vadd.f32 %v674_v0, %v479_v63 }
 0x219   : > { %v676_v4 = vadd.f32 %v675_v2, %v480_v1 }
 0x21b   : > { %v677_v6 = vadd.f32 %v676_v4, %v481_v3  ;;  %684 = sbr.rel (%p869_p9) target bundleno = 767 (0x2ff), region = 56 }
 0x21d   : > { %v678_v8 = vadd.f32 %v677_v6, %v482_v5 }
 0x21f   : > { %v679_v9 = vadd.f32 %v678_v8, %v483_v7 }
 0x221   : > { %680 = vst [vmem:[#allocation2] sm:$0xff] %v679_v9 }
 0x228   : > { %v685_v10 = vld [vmem:[#allocation2] sm:$0xff] }
 0x229   : > { %686 = vadd.xlane.f32.xlu0 %v685_v10 }
 0x22d   : > { %706 = vadd.xlane.f32.xlu0 %v705_v15 }
 0x2b6   : > { %v687_v16 = vpop.xlane.xlu0 %686 }
 0x2b7   : > { %v688_v17 = vrot.slane %v687_v16, 4 }
 0x2b9   : > { %v689_v18 = vadd.f32 %v688_v17, %v687_v16 }
 0x2ba   : > { %v707_v23 = vpop.xlane.xlu0 %706 }
 0x2bb   : > { %v690_v19 = vrot.slane %v689_v18, 2  ;;  %v708_v24 = vmul.f32 0.0051020407, %v707_v23 }
 0x2bd   : > { %v691_v20 = vadd.f32 %v690_v19, %v689_v18  ;;  %v712_v25 = vrot.slane %v708_v24, 7 }
 0x2bf   : > { %v692_v21 = vrot.slane %v691_v20, 1  ;;  %v714_v27 = vmul.f32 %v712_v25, %v709_v26 }
 0x2c1   : > { %v693_v22 = vadd.f32 %v692_v21, %v691_v20  ;;  %v716_v28 = vrot.slane %v714_v27, 1 }
 0x2c3   : > { %877 = vpush %v693_v22  ;;  %v719_v29 = vsel %vm718_vm2, %v716_v28, 0.0 }
 0x2c4   : > { %v720_v30 = vrot.slane %v719_v29, 4 }
 0x2c6   : > { %v721_v31 = vadd.f32 %v720_v30, %v719_v29 }
 0x2c8   : > { %v722_v32 = vrot.slane %v721_v31, 2 }
 0x2ca   : > { %v723_v33 = vadd.f32 %v722_v32, %v721_v31 }
 0x2cc   : > { %v724_v34 = vrot.slane %v723_v33, 1 }
 0x2ce   : > { %v725_v38 = vadd.f32 %v724_v34, %v723_v33 }
 0x2f4   : > { %s878_s29 = spop %877 }
 0x2f5   : > { %v695_v35 = vstv %s878_s29 }
 0x2f6   : > { %v696_v36 = vmul.f32 2.4912308e-06, %v695_v35 }
 0x2f8   : > { %v710_v37 = vmul.f32 %v709_v26, %v696_v36 }
 0x2fa   : > { %v726_v40 = vadd.f32 %v725_v38, %v710_v37 }
 0x2fc   : > { %v728_v41 = vadd.f32 %v727_v39, %v726_v40 }
 0x2fe   : > { %730 = vst.msk [vmem:[%s280_s28] sm:$0x1] %vm729_vm3, %v728_v41 }
 0x2ff PF: > { %s1828_s7 = sld [smem:[#allocation15_spill]]  ;;  %s1829_s11 = sld [smem:[#allocation21_spill]] }
 0x300   : > { %s744_s13 = sshll.u32 %s280_s28, 4  ;;  %s732_s15 = scalar_lea.sflag [#allocation5], %s1504_s9  ;;  %s745_s13 = int_to_ptr.vmem [resolvable:$true] %s744_s13 }
 0x301   : > { %s1089_s22 = scalar_lea.vmem %s745_s13, 16  ;;  %s1227_s18 = smov [#allocation9]  }
 0x302   : > { %p1090_p0 = scmp.ne.s32.totalorder %s745_s13, %s1089_s22  ;;  %s1093_s12 = sshll.u32 %s1227_s18, 4  ;;  %s1094_s12 = int_to_ptr.vmem [resolvable:$false] %s1093_s12 }
 0x303   : > { %s1095_s5 = scalar_lea.vmem %s1094_s12, 32  ;;  %p1096_p11 = scmp.lt.s32.totalorder %s745_s13, %s1094_s12 }
 0x304   : > { %p1091_p10 = pnand %p1090_p0, %p1449_p6  ;;  %p1097_p1 = scmp.lt.s32.totalorder %s1095_s5, %s1089_s22 }
 0x305   : > { %s870_s10 = sshll.u32 %s1828_s7, 4 }
 0x306   : > { %s1726_s6 = scalar_lea.hbm %s1829_s11, %s870_s10  ;;  %p1092_p2 = pneg %p1091_p10 }
 0x307   : > { %p1098_p3 = por %p1097_p1, %p1096_p11 }
 0x309   : > { %p1099_p7 = pnand %p1098_p3, %p1092_p2 }
 0x30b   : > { %1102 = shalt.err (!%p1099_p7)
}
 0x30c   : > { %s1103_s9 = scalar_lea.hbm %s1726_s6, 16  ;;  %s1107_s28 = scalar_lea.hbm %s1829_s11, 32 }
 0x30d   : > { %p1104_p13 = scmp.ne.s32.totalorder %s1726_s6, %s1103_s9  ;;  %p1108_p8 = scmp.lt.u32.totalorder %s1726_s6, %s1829_s11 }
 0x30e   : > { %p1109_p5 = scmp.lt.u32.totalorder %s1107_s28, %s1103_s9  ;;  %p1111_p0 = scmp.lt.u32.totalorder %s1103_s9, %s1726_s6 }
 0x30f   : > { %p1105_p12 = pnand %p1104_p13, %p1449_p6 }
 0x310   : > { %p1110_p9 = por %p1109_p5, %p1108_p8 }
 0x311   : > { %p1106_p4 = pneg %p1105_p12 }
 0x312   : > { %p1112_p10 = por %p1111_p0, %p1110_p9 }
 0x314   : > { %p1113_p2 = pnand %p1112_p10, %p1106_p4 }
 0x316   : > { %1116 = shalt.err (!%p1113_p2)
}
 0x317   : > { %887 = dma.vmem_to_hbm [thread:$0]  (%p1449_p6), %s745_s13, 16, %s1726_s6, %s732_s15  }
 0x318 PF: > { %s1830_s29 = sld [smem:[#allocation14_spill]]  ;;  %s1831_s7 = sld [smem:[#allocation17_spill]] }
 0x319   : > { %p907_p11 = scmp.ge.s32.totalorder %s1219_s25, 2 }
 0x31e   : > { %s756_s10 = sand.u32 1, %s1830_s29   ;;  %p1832_p1 = scmp.ne.s32.totalorder %s1831_s7, 0 }
 0x31f   : > { %s757_s14 = scalar_lea.sflag [#allocation5], %s756_s10 }
 0x320   : > { %p901_p3 = pnand %p907_p11, %p1832_p1 }
 0x322   : > { %1174 = dma.done.wait (!%p901_p3), %s757_s14, 16  }
 0x323   : > { %1176 = vsyncadd (!%p901_p3), %s757_s14, 4294967280  ;;  %s23_s25 = sadd.s32 1, %s1219_s25   ;;  %s1833_s21 = sld [smem:[#allocation16_spill]] }
 0x324   : > { %p20_p7 = scmp.ge.s32.totalorder %s23_s25, 6   ;;  %s1834_s4 = sld [smem:[#allocation18_spill]] }
 0x325   : > { %s1835_s27 = sld [smem:[#allocation19_spill]]  ;;  %s1836_s15 = smov %s1183_s16 }
 0x326   : > { %s1837_s16 = smov %s1187_s17  ;;  %s1838_s17 = smov %s1443_s23 }
 0x327   : > { %s1839_s18 = smov %s1195_s19  ;;  %s1840_s19 = smov %s1199_s20 }
 0x328   : > { %s1841_s20 = smov %s1391_s30  ;;  %s1842_s22 = smov %s1215_s24 }
 0x329   :  { %22 = sbr.rel (!%p20_p7) target bundleno = 14 (0xe), region = 106 }
 0x32a   : > { %s1843_s23 = smov %s1834_s4 }
 0x32b   : > { %s1844_s24 = smov %s1835_s27 }
 0x330   :  { %761 = vsyncpa [#allocation4], 1 }
 0x331   :  { %763 = vsyncpa [#allocation4 + $0x1], 1 }
 0x332   :  { %764 = vsyncpa [#allocation7], 1 }
 0x333   :  { %766 = vsyncpa [#allocation7 + $0x1], 1 }
 0x334   :  { %767 = vsyncpa [#allocation5], 1 }
 0x335   :  { %769 = vsyncpa [#allocation5 + $0x1], 1 }

</bundles_post_ra>
